<compile_context>
chip_gen: v7x
topology: tpu7x:2x2x1
jax: 0.10.0
libtpu: 0.0.40
codegen_flags: <defaults>
</compile_context>

<pallas_src>
import math
import functools

import jax
import jax.numpy as jnp
from jax.experimental import pallas as pl
from jax.experimental.pallas import tpu as pltpu

LANE = 128


def _round_up(x, m):
    return (x + m - 1) // m * m


def _pad_to(a, shape):
    pads = [(0, s - d) for d, s in zip(a.shape, shape)]
    return jnp.pad(a, pads)


# ---------------------------------------------------------------------------
# Pallas kernel: full padded MLP forward for one batch tile.
#   x_ref  : (TILE_B, IN_PAD)   f32   (concat([y, z]) zero-padded on lanes)
#   w*_ref : bf16 padded weights,  b*_ref : f32 padded biases (1, dim_pad)
#   out_ref: (TILE_B, OUT_PAD)  f32
# ---------------------------------------------------------------------------
def generator_kernel(x_ref, w0_ref, b0_ref, w1_ref, b1_ref, w2_ref, b2_ref,
                     out_ref):
    x = x_ref[...].astype(jnp.bfloat16)

    h = jnp.dot(x, w0_ref[...], preferred_element_type=jnp.float32) + b0_ref[...]
    h = jax.nn.sigmoid(h)

    h = (jnp.dot(h.astype(jnp.bfloat16), w1_ref[...],
                 preferred_element_type=jnp.float32) + b1_ref[...])
    h = jax.nn.sigmoid(h)

    out_ref[...] = (jnp.dot(h.astype(jnp.bfloat16), w2_ref[...],
                            preferred_element_type=jnp.float32) + b2_ref[...])


# ---------------------------------------------------------------------------
# Wrapper
# ---------------------------------------------------------------------------
def generator_forward(y, params, seed, output_shape):
    """y: (B, F) float32. Returns (B, *output_shape) float32."""
    (w0, b0), (w1, b1), (w2, b2) = params
    B, F = y.shape
    out_dim = math.prod(output_shape)

    # torch.rand_like(y): uniform [0, 1) noise, same shape as y.
    z = jax.random.uniform(jax.random.PRNGKey(seed), y.shape, jnp.float32)
    x = jnp.concatenate([y, z], axis=-1)                 # (B, 2F) = (B, latent)

    in_pad = w0.shape[0]          # round_up(latent_dim, 128)
    out_pad = w2.shape[1]         # round_up(prod(output_shape), 128)

    # Batch tiling: keep tiles modest so double-buffered y/out tiles plus the
    # resident padded weights fit comfortably in scoped VMEM on all of
    # v5e / v6e / v7x (v7x has only 64 MiB physical VMEM).
    if B <= 256:
        tile_b = max(8, _round_up(B, 8))
        b_pad = tile_b
    else:
        tile_b = 256
        b_pad = _round_up(B, tile_b)

    x_p = _pad_to(x, (b_pad, in_pad))

    const2 = lambda i: (0, 0)     # weights / biases resident across batch tiles

    out_p = pl.pallas_call(
        generator_kernel,
        out_shape=jax.ShapeDtypeStruct((b_pad, out_pad), jnp.float32),
        grid=(b_pad // tile_b,),
        in_specs=[
            pl.BlockSpec((tile_b, in_pad), lambda i: (i, 0)),
            pl.BlockSpec(w0.shape, const2),
            pl.BlockSpec(b0.shape, const2),
            pl.BlockSpec(w1.shape, const2),
            pl.BlockSpec(b1.shape, const2),
            pl.BlockSpec(w2.shape, const2),
            pl.BlockSpec(b2.shape, const2),
        ],
        out_specs=pl.BlockSpec((tile_b, out_pad), lambda i: (i, 0)),
        compiler_params=pltpu.CompilerParams(
            dimension_semantics=("parallel",)),
    )(x_p, w0, b0, w1, b1, w2, b2)

    out = out_p[:B, :out_dim]
    return out.reshape(-1, *output_shape)


# ---------------------------------------------------------------------------
# Deterministic parameter init (mirrors nn.Linear default: U(-k, k), k=1/sqrt(fan_in)).
# Weights are stored pre-transposed as (in_dim, out_dim), zero-padded to
# multiples of 128 on both axes, and cast to bf16; biases stay f32 (1, out_pad).
# ---------------------------------------------------------------------------
def init_generator_params(key, latent_dim, layer_sizes, output_shape):
    dims = [latent_dim] + list(layer_sizes) + [math.prod(output_shape)]
    params = []
    for in_dim, out_dim in zip(dims[:-1], dims[1:]):
        key, kw, kb = jax.random.split(key, 3)
        bound = 1.0 / math.sqrt(in_dim)
        w = jax.random.uniform(kw, (in_dim, out_dim), jnp.float32, -bound, bound)
        b = jax.random.uniform(kb, (1, out_dim), jnp.float32, -bound, bound)
        w_p = _pad_to(w, (_round_up(in_dim, LANE),
                          _round_up(out_dim, LANE))).astype(jnp.bfloat16)
        b_p = _pad_to(b, (1, _round_up(out_dim, LANE)))
        params.append((w_p, b_p))
    return params


if __name__ == "__main__":
    # Small, forward-consistent shapes:
    #   y: (B, F) with latent_dim = 2 * F  (since x = cat([y, rand_like(y)], -1))
    batch = 8
    feat = 16
    latent_dim = 2 * feat
    layer_sizes = [64, 32]
    output_shape = (2, 4, 4)          # prod = 32

    key = jax.random.PRNGKey(0)
    key_y, key_p = jax.random.split(key)

    y = jax.random.normal(key_y, (batch, feat), jnp.float32)
    params = init_generator_params(key_p, latent_dim, layer_sizes, output_shape)

    fwd = jax.jit(functools.partial(generator_forward, output_shape=output_shape))
    out = fwd(y, params, 1234)
    out = jax.block_until_ready(out)

    assert out.shape == (batch, *output_shape), out.shape
    assert out.dtype == jnp.float32
    assert bool(jnp.all(jnp.isfinite(out)))
    print("KERNEL_OK")
</pallas_src>

<mosaic_0001>
module attributes {stable_mosaic.version = 11 : i64} {
  func.func @generator_kernel(%arg0: i32, %arg1: memref<8x128xf32, #tpu.memory_space<vmem>>, %arg2: memref<128x128xbf16, #tpu.memory_space<vmem>>, %arg3: memref<1x128xf32, #tpu.memory_space<vmem>>, %arg4: memref<128x128xbf16, #tpu.memory_space<vmem>>, %arg5: memref<1x128xf32, #tpu.memory_space<vmem>>, %arg6: memref<128x128xbf16, #tpu.memory_space<vmem>>, %arg7: memref<1x128xf32, #tpu.memory_space<vmem>>, %arg8: memref<8x128xf32, #tpu.memory_space<vmem>>) attributes {dimension_semantics = [#tpu.dimension_semantics<parallel>], iteration_bounds = array<i64: 1>, scalar_prefetch = 0 : i64, scratch_operands = 0 : i64, tpu.core_type = #tpu.core_type<tc>, window_params = [{transform_indices = @transform_0, window_bounds = array<i64: 8, 128>}, {pipeline_mode = #tpu.pipeline_mode<synchronous>, transform_indices = @transform_1, window_bounds = array<i64: 128, 128>}, {pipeline_mode = #tpu.pipeline_mode<synchronous>, transform_indices = @transform_2, window_bounds = array<i64: 1, 128>}, {pipeline_mode = #tpu.pipeline_mode<synchronous>, transform_indices = @transform_3, window_bounds = array<i64: 128, 128>}, {pipeline_mode = #tpu.pipeline_mode<synchronous>, transform_indices = @transform_4, window_bounds = array<i64: 1, 128>}, {pipeline_mode = #tpu.pipeline_mode<synchronous>, transform_indices = @transform_5, window_bounds = array<i64: 128, 128>}, {pipeline_mode = #tpu.pipeline_mode<synchronous>, transform_indices = @transform_6, window_bounds = array<i64: 1, 128>}, {transform_indices = @transform_7, window_bounds = array<i64: 8, 128>}]} {
    %c0 = arith.constant 0 : index
    %c0_0 = arith.constant 0 : index
    %0 = vector.load %arg1[%c0, %c0_0] : memref<8x128xf32, #tpu.memory_space<vmem>>, vector<8x128xf32>
    %1 = arith.truncf %0 : vector<8x128xf32> to vector<8x128xbf16>
    %c0_1 = arith.constant 0 : index
    %c0_2 = arith.constant 0 : index
    %2 = vector.load %arg2[%c0_1, %c0_2] : memref<128x128xbf16, #tpu.memory_space<vmem>>, vector<128x128xbf16>
    %cst = arith.constant dense<0.000000e+00> : vector<8x128xf32>
    %3 = tpu.matmul %1, %2, %cst {dimension_numbers = #tpu.dot_dimension_numbers<[1], [0], [0], [1], [0, 0, 1, 1], [], []>} : vector<8x128xbf16>, vector<128x128xbf16>, vector<8x128xf32> -> vector<8x128xf32>
    %c0_3 = arith.constant 0 : index
    %c0_4 = arith.constant 0 : index
    %4 = vector.load %arg3[%c0_3, %c0_4] : memref<1x128xf32, #tpu.memory_space<vmem>>, vector<1x128xf32>
    %5 = vector.broadcast %4 : vector<1x128xf32> to vector<8x128xf32>
    %6 = arith.addf %3, %5 : vector<8x128xf32>
    %7 = arith.negf %6 : vector<8x128xf32>
    %8 = math.exp %7 : vector<8x128xf32>
    %cst_5 = arith.constant 1.000000e+00 : f32
    %9 = vector.broadcast %cst_5 : f32 to vector<8x128xf32>
    %10 = arith.addf %9, %8 : vector<8x128xf32>
    %11 = arith.divf %9, %10 : vector<8x128xf32>
    %12 = arith.truncf %11 : vector<8x128xf32> to vector<8x128xbf16>
    %c0_6 = arith.constant 0 : index
    %c0_7 = arith.constant 0 : index
    %13 = vector.load %arg4[%c0_6, %c0_7] : memref<128x128xbf16, #tpu.memory_space<vmem>>, vector<128x128xbf16>
    %cst_8 = arith.constant dense<0.000000e+00> : vector<8x128xf32>
    %14 = tpu.matmul %12, %13, %cst_8 {dimension_numbers = #tpu.dot_dimension_numbers<[1], [0], [0], [1], [0, 0, 1, 1], [], []>} : vector<8x128xbf16>, vector<128x128xbf16>, vector<8x128xf32> -> vector<8x128xf32>
    %c0_9 = arith.constant 0 : index
    %c0_10 = arith.constant 0 : index
    %15 = vector.load %arg5[%c0_9, %c0_10] : memref<1x128xf32, #tpu.memory_space<vmem>>, vector<1x128xf32>
    %16 = vector.broadcast %15 : vector<1x128xf32> to vector<8x128xf32>
    %17 = arith.addf %14, %16 : vector<8x128xf32>
    %18 = arith.negf %17 : vector<8x128xf32>
    %19 = math.exp %18 : vector<8x128xf32>
    %cst_11 = arith.constant 1.000000e+00 : f32
    %20 = vector.broadcast %cst_11 : f32 to vector<8x128xf32>
    %21 = arith.addf %20, %19 : vector<8x128xf32>
    %22 = arith.divf %20, %21 : vector<8x128xf32>
    %23 = arith.truncf %22 : vector<8x128xf32> to vector<8x128xbf16>
    %c0_12 = arith.constant 0 : index
    %c0_13 = arith.constant 0 : index
    %24 = vector.load %arg6[%c0_12, %c0_13] : memref<128x128xbf16, #tpu.memory_space<vmem>>, vector<128x128xbf16>
    %cst_14 = arith.constant dense<0.000000e+00> : vector<8x128xf32>
    %25 = tpu.matmul %23, %24, %cst_14 {dimension_numbers = #tpu.dot_dimension_numbers<[1], [0], [0], [1], [0, 0, 1, 1], [], []>} : vector<8x128xbf16>, vector<128x128xbf16>, vector<8x128xf32> -> vector<8x128xf32>
    %c0_15 = arith.constant 0 : index
    %c0_16 = arith.constant 0 : index
    %26 = vector.load %arg7[%c0_15, %c0_16] : memref<1x128xf32, #tpu.memory_space<vmem>>, vector<1x128xf32>
    %27 = vector.broadcast %26 : vector<1x128xf32> to vector<8x128xf32>
    %28 = arith.addf %25, %27 : vector<8x128xf32>
    %c0_17 = arith.constant 0 : index
    %c0_18 = arith.constant 0 : index
    %29 = vector.load %arg8[%c0_17, %c0_18] : memref<8x128xf32, #tpu.memory_space<vmem>>, vector<8x128xf32>
    tpu.vector_store %arg8[%c0_17, %c0_18], %28 {strides = array<i32>} : memref<8x128xf32, #tpu.memory_space<vmem>>, vector<8x128xf32>,
    return
  }
  func.func @transform_0(%arg0: i32) -> (i32, i32) {
    %c0_i32 = arith.constant 0 : i32
    %c0_i32_0 = arith.constant 0 : i32
    return %arg0, %c0_i32 : i32, i32
  }
  func.func @transform_1(%arg0: i32) -> (i32, i32) {
    %c0_i32 = arith.constant 0 : i32
    %c0_i32_0 = arith.constant 0 : i32
    %c0_i32_1 = arith.constant 0 : i32
    return %c0_i32, %c0_i32_0 : i32, i32
  }
  func.func @transform_2(%arg0: i32) -> (i32, i32) {
    %c0_i32 = arith.constant 0 : i32
    %c0_i32_0 = arith.constant 0 : i32
    %c0_i32_1 = arith.constant 0 : i32
    return %c0_i32, %c0_i32_0 : i32, i32
  }
  func.func @transform_3(%arg0: i32) -> (i32, i32) {
    %c0_i32 = arith.constant 0 : i32
    %c0_i32_0 = arith.constant 0 : i32
    %c0_i32_1 = arith.constant 0 : i32
    return %c0_i32, %c0_i32_0 : i32, i32
  }
  func.func @transform_4(%arg0: i32) -> (i32, i32) {
    %c0_i32 = arith.constant 0 : i32
    %c0_i32_0 = arith.constant 0 : i32
    %c0_i32_1 = arith.constant 0 : i32
    return %c0_i32, %c0_i32_0 : i32, i32
  }
  func.func @transform_5(%arg0: i32) -> (i32, i32) {
    %c0_i32 = arith.constant 0 : i32
    %c0_i32_0 = arith.constant 0 : i32
    %c0_i32_1 = arith.constant 0 : i32
    return %c0_i32, %c0_i32_0 : i32, i32
  }
  func.func @transform_6(%arg0: i32) -> (i32, i32) {
    %c0_i32 = arith.constant 0 : i32
    %c0_i32_0 = arith.constant 0 : i32
    %c0_i32_1 = arith.constant 0 : i32
    return %c0_i32, %c0_i32_0 : i32, i32
  }
  func.func @transform_7(%arg0: i32) -> (i32, i32) {
    %c0_i32 = arith.constant 0 : i32
    %c0_i32_0 = arith.constant 0 : i32
    return %arg0, %c0_i32 : i32, i32
  }
}

</mosaic_0001>

<bundles_post_ra>
// kernel: generator_forward.1
= control target key start
LH: loop header
LB: loop body
LE: loop exit
PB: predicated region body
PF: predicated region fallthrough
CT: control target
= control target key end

     0   :  { %12 = vsyncpa [#allocation3], 0  ;;  %s752_s0 = inlined_call_operand.vmem [shape: f32[8,128], index: 0, kind: input, shape index: {}]   ;;  %s753_s1 = inlined_call_operand.vmem [shape: bf16[128,128], index: 1, kind: input, shape index: {}]   ;;  %s754_s2 = inlined_call_operand.vmem [shape: f32[1,128], index: 2, kind: input, shape index: {}]   ;;  %s755_s3 = inlined_call_operand.hbm [shape: bf16[128,128], index: 3, kind: input, shape index: {}]   ;;  %s756_s4 = inlined_call_operand.vmem [shape: f32[1,128], index: 4, kind: input, shape index: {}]   ;;  %s757_s5 = inlined_call_operand.hbm [shape: bf16[128,128], index: 5, kind: input, shape index: {}]   ;;  %s758_s6 = inlined_call_operand.vmem [shape: f32[1,128], index: 6, kind: input, shape index: {}]   ;;  %s759_s7 = inlined_call_operand.vmem [shape: f32[8,128], index: 7, kind: output, shape index: {}]  }
   0x1   :  { %13 = vsyncpa [#allocation5], 0  ;;  %s613_s24 = smov [#allocation2]   ;;  %s565_s28 = scalar_lea.hbm %s755_s3, 1024 }
   0x2   :  { %s25_s25 = sshll.u32 %s613_s24, 4  ;;  %p566_p0 = scmp.ne.s32.totalorder %s755_s3, %s565_s28  ;;  %s26_s25 = int_to_ptr.vmem [resolvable:$true] %s25_s25 }
   0x3   :  { %p569_p1 = scmp.lt.u32.totalorder %s565_s28, %s755_s3 }
   0x5   :  { %p571_p2 = pnand %p569_p1, %p566_p0 }
   0x7   :  { %574 = shalt.err (!%p571_p2)
}
   0x8   :  { %s575_s10 = scalar_lea.vmem %s26_s25, 1024  ;;  %p580_p4 = scmp.lt.s32.totalorder %s26_s25, %s26_s25 }
   0x9   :  { %p576_p3 = scmp.ne.s32.totalorder %s26_s25, %s575_s10  ;;  %p581_p5 = scmp.lt.s32.totalorder %s575_s10, %s575_s10 }
   0xb   :  { %p582_p6 = por %p581_p5, %p580_p4 }
   0xd   :  { %p583_p7 = pnand %p582_p6, %p576_p3 }
   0xf   :  { %586 = shalt.err (!%p583_p7)
}
  0x10   :  { %s614_s11 = smov 64   ;;  %s615_s12 = smov 4  }
  0x11   :  { %31 = dma.hbm_to_vmem [thread:$0]  %s755_s3, 1024, %s26_s25, [#allocation3], %s614_s11, %s614_s11, %s615_s12  }
  0x12   :  { %s616_s15 = smov [#allocation4]   ;;  %s587_s19 = scalar_lea.hbm %s757_s5, 1024 }
  0x13   :  { %s39_s16 = sshll.u32 %s616_s15, 4  ;;  %p588_p8 = scmp.ne.s32.totalorder %s757_s5, %s587_s19  ;;  %s40_s16 = int_to_ptr.vmem [resolvable:$true] %s39_s16 }
  0x14   :  { %p591_p9 = scmp.lt.u32.totalorder %s587_s19, %s757_s5 }
  0x16   :  { %p593_p10 = pnand %p591_p9, %p588_p8 }
  0x18   :  { %596 = shalt.err (!%p593_p10)
}
  0x19   :  { %s597_s24 = scalar_lea.vmem %s40_s16, 1024  ;;  %p602_p12 = scmp.lt.s32.totalorder %s40_s16, %s40_s16 }
  0x1a   :  { %p598_p11 = scmp.ne.s32.totalorder %s40_s16, %s597_s24  ;;  %p603_p13 = scmp.lt.s32.totalorder %s597_s24, %s597_s24 }
  0x1c   :  { %p604_p0 = por %p603_p13, %p602_p12 }
  0x1e   :  { %p605_p1 = pnand %p604_p0, %p598_p11 }
  0x20   :  { %608 = shalt.err (!%p605_p1)
}
  0x21   :  { %45 = dma.hbm_to_vmem [thread:$0]  %s757_s5, 1024, %s40_s16, [#allocation5], %s614_s11, %s614_s11, %s615_s12  }
  0x22   :  { %609 = dma.done.wait [#allocation3], 1024  }
  0x23   :  { %610 = vsyncadd [#allocation3], 4294966272 }
  0x24   :  { %611 = dma.done.wait [#allocation5], 1024  }
  0x25   :  { %612 = vsyncadd [#allocation5], 4294966272  ;;  %v617_v0 = vmov 0.0   ;;  %vm618_vm0 = vmmov 0   ;;  %v533_v1 = vld [vmem:[%s753_s1] sm:$0xff]   ;;  %v534_v2 = vld [vmem:[%s753_s1 + $0x8] sm:$0xff]  }
  0x26   :  { %467 = vmatprep.subr.bf16.mxu0 %v617_v0  ;;  %483 = vmatprep.mubr.msk.bf16.mxu0 %vm618_vm0, %v617_v0  ;;  %v535_v3 = vld [vmem:[%s753_s1 + $0x10] sm:$0xff]   ;;  %v536_v4 = vld [vmem:[%s753_s1 + $0x18] sm:$0xff]   ;;  %v537_v5 = vld [vmem:[%s753_s1 + $0x20] sm:$0xff]  }
  0x27   :  { %487 = vmatprep.subr.bf16.mxu1 %v617_v0  ;;  %503 = vmatprep.mubr.msk.bf16.mxu1 %vm618_vm0, %v617_v0  ;;  %v538_v6 = vld [vmem:[%s753_s1 + $0x28] sm:$0xff]   ;;  %v539_v7 = vld [vmem:[%s753_s1 + $0x30] sm:$0xff]   ;;  %v540_v8 = vld [vmem:[%s753_s1 + $0x38] sm:$0xff]  }
  0x28   :  { %468 = vmatpush3.bf16.msra.mxu0 %v533_v1  ;;  %v55_v9 = vld [vmem:[%s752_s0] sm:$0xff]  ;;  %v542_v12 = vld [vmem:[#allocation2 + $0x8] sm:$0xff]   ;;  %v543_v13 = vld [vmem:[#allocation2 + $0x10] sm:$0xff]  }
  0x29   :  { %469 = vmatprep.subr.bf16.mxu0 %v617_v0  ;;  %v56_v10 = vpack.c.bf16 %v55_v9, %v55_v9  ;;  %v541_v11 = vld [vmem:[#allocation2] sm:$0xff]   ;;  %v544_v14 = vld [vmem:[#allocation2 + $0x18] sm:$0xff]   ;;  %v546_v16 = vld [vmem:[#allocation2 + $0x28] sm:$0xff]  }
  0x2a   :  { %488 = vmatpush3.bf16.msra.mxu1 %v541_v11  ;;  %v545_v15 = vld [vmem:[#allocation2 + $0x20] sm:$0xff]   ;;  %v547_v17 = vld [vmem:[#allocation2 + $0x30] sm:$0xff]   ;;  %v548_v18 = vld [vmem:[#allocation2 + $0x38] sm:$0xff]  }
  0x2b   :  { %489 = vmatprep.subr.bf16.mxu1 %v617_v0  ;;  %v411_v19 = vld [vmem:[%s754_s2] ss:$0 sm:$0xff]  ;;  %v550_v31 = vld [vmem:[#allocation4 + $0x8] sm:$0xff]   ;;  %v551_v32 = vld [vmem:[#allocation4 + $0x10] sm:$0xff]  }
  0x2c   :  { %470 = vmatpush3.bf16.msra.mxu0 %v534_v2  ;;  %v549_v30 = vld [vmem:[#allocation4] sm:$0xff]   ;;  %v552_v33 = vld [vmem:[#allocation4 + $0x18] sm:$0xff]   ;;  %v554_v35 = vld [vmem:[#allocation4 + $0x28] sm:$0xff]  }
  0x2d   :  { %471 = vmatprep.subr.bf16.mxu0 %v617_v0  ;;  %v553_v34 = vld [vmem:[#allocation4 + $0x20] sm:$0xff]   ;;  %v555_v36 = vld [vmem:[#allocation4 + $0x30] sm:$0xff]   ;;  %v556_v37 = vld [vmem:[#allocation4 + $0x38] sm:$0xff]  }
  0x2e   :  { %490 = vmatpush3.bf16.msra.mxu1 %v542_v12  ;;  %v421_v38 = vld [vmem:[%s756_s4] ss:$0 sm:$0xff] }
  0x2f   :  { %491 = vmatprep.subr.bf16.mxu1 %v617_v0  ;;  %v431_v49 = vld [vmem:[%s758_s6] ss:$0 sm:$0xff] }
  0x30   :  { %472 = vmatpush3.bf16.msra.mxu0 %v535_v3 }
  0x31   :  { %473 = vmatprep.subr.bf16.mxu0 %v617_v0 }
  0x32   :  { %492 = vmatpush3.bf16.msra.mxu1 %v543_v13 }
  0x33   :  { %493 = vmatprep.subr.bf16.mxu1 %v617_v0 }
  0x34   :  { %474 = vmatpush3.bf16.msra.mxu0 %v536_v4 }
  0x35   :  { %475 = vmatprep.subr.bf16.mxu0 %v617_v0 }
  0x36   :  { %494 = vmatpush3.bf16.msra.mxu1 %v544_v14 }
  0x37   :  { %495 = vmatprep.subr.bf16.mxu1 %v617_v0 }
  0x38   :  { %476 = vmatpush3.bf16.msra.mxu0 %v537_v5 }
  0x39   :  { %477 = vmatprep.subr.bf16.mxu0 %v617_v0 }
  0x3a   :  { %496 = vmatpush3.bf16.msra.mxu1 %v545_v15 }
  0x3b   :  { %497 = vmatprep.subr.bf16.mxu1 %v617_v0 }
  0x3c   :  { %478 = vmatpush3.bf16.msra.mxu0 %v538_v6 }
  0x3d   :  { %479 = vmatprep.subr.bf16.mxu0 %v617_v0 }
  0x3e   :  { %498 = vmatpush3.bf16.msra.mxu1 %v546_v16 }
  0x3f   :  { %499 = vmatprep.subr.bf16.mxu1 %v617_v0 }
  0x40   :  { %480 = vmatpush3.bf16.msra.mxu0 %v539_v7 }
  0x41   :  { %481 = vmatprep.subr.bf16.mxu0 %v617_v0 }
  0x42   :  { %500 = vmatpush3.bf16.msra.mxu1 %v547_v17 }
  0x43   :  { %501 = vmatprep.subr.bf16.mxu1 %v617_v0 }
  0x44   :  { %482 = vmatpush3.bf16.msra.mxu0 %v540_v8 }
  0x45   :  { %507 = vmatprep.subr.bf16.mxu0 %v617_v0 }
  0x46   :  { %502 = vmatpush3.bf16.msra.mxu1 %v548_v18 }
  0x47   :  { %484 = vmatmul.mubr.bf16.vlgmr.msra.gmra.mrb[0].mxu0 %v56_v10 }
  0x48   :  { %523 = vmatprep.mubr.msk.bf16.mxu0 %vm618_vm0, %v617_v0  ;;  %508 = vmatpush3.bf16.msra.mxu0 %v549_v30 }
  0x49   :  { %509 = vmatprep.subr.bf16.mxu0 %v617_v0 }
  0x4c   :  { %510 = vmatpush3.bf16.msra.mxu0 %v550_v31 }
  0x4d   :  { %511 = vmatprep.subr.bf16.mxu0 %v617_v0 }
  0x50   :  { %512 = vmatpush3.bf16.msra.mxu0 %v551_v32 }
  0x51   :  { %513 = vmatprep.subr.bf16.mxu0 %v617_v0 }
  0x54   :  { %514 = vmatpush3.bf16.msra.mxu0 %v552_v33 }
  0x55   :  { %515 = vmatprep.subr.bf16.mxu0 %v617_v0 }
  0x58   :  { %516 = vmatpush3.bf16.msra.mxu0 %v553_v34 }
  0x59   :  { %517 = vmatprep.subr.bf16.mxu0 %v617_v0 }
  0x5c   :  { %518 = vmatpush3.bf16.msra.mxu0 %v554_v35 }
  0x5d   :  { %519 = vmatprep.subr.bf16.mxu0 %v617_v0 }
  0x60   :  { %520 = vmatpush3.bf16.msra.mxu0 %v555_v36 }
  0x61   :  { %521 = vmatprep.subr.bf16.mxu0 %v617_v0 }
  0x64   :  { %522 = vmatpush3.bf16.msra.mxu0 %v556_v37 }
 0x11a   :  { %v162_v20 = vpop.f32.mrb[0].mxu0 }
 0x11b   :  { %v163_v21 = vadd.f32 %v411_v19, %v162_v20  ;;  %v485_v22 = vpop.f32.mrb[1].mxu0 }
 0x11c   :  { %v165_v23 = vpop.f32.mrb[2].mxu0 }
 0x11d   :  { %v420_v24 = vmul.f32 -1.442695, %v163_v21  ;;  %v486_v25 = vpop.f32.mrb[3].mxu0 }
 0x11f   :  { %557 = vpow2.f32 %v420_v24 }
 0x129   :  { %v558_v26 = vpop.eup %557 }
 0x12a   :  { %v171_v27 = vadd.f32 1.0, %v558_v26 }
 0x12c   :  { %559 = vrcp.f32 %v171_v27 }
 0x136   :  { %v560_v28 = vpop.eup %559 }
 0x137   :  { %v174_v29 = vpack.c.bf16 %v560_v28, %v560_v28 }
 0x139   :  { %504 = vmatmul.mubr.bf16.vlgmr.msra.gmra.mrb[0].mxu1 %v174_v29 }
 0x20c   :  { %v280_v39 = vpop.f32.mrb[0].mxu1 }
 0x20d   :  { %v281_v40 = vadd.f32 %v421_v38, %v280_v39  ;;  %v505_v41 = vpop.f32.mrb[1].mxu1 }
 0x20e   :  { %v283_v42 = vpop.f32.mrb[2].mxu1 }
 0x20f   :  { %v430_v43 = vmul.f32 -1.442695, %v281_v40  ;;  %v506_v44 = vpop.f32.mrb[3].mxu1 }
 0x211   :  { %561 = vpow2.f32 %v430_v43 }
 0x21b   :  { %v562_v45 = vpop.eup %561 }
 0x21c   :  { %v289_v46 = vadd.f32 1.0, %v562_v45 }
 0x21e   :  { %563 = vrcp.f32 %v289_v46 }
 0x228   :  { %v564_v47 = vpop.eup %563 }
 0x229   :  { %v292_v48 = vpack.c.bf16 %v564_v47, %v564_v47 }
 0x22b   :  { %524 = vmatmul.mubr.bf16.vlgmr.msra.gmra.mrb[4].mxu0 %v292_v48 }
 0x2fe   :  { %v398_v50 = vpop.f32.mrb[4].mxu0 }
 0x2ff   :  { %v399_v51 = vadd.f32 %v431_v49, %v398_v50  ;;  %v525_v52 = vpop.f32.mrb[5].mxu0 }
 0x300   :  { %v401_v53 = vpop.f32.mrb[6].mxu0 }
 0x301   :  { %404 = vst [vmem:[%s759_s7] sm:$0xff] %v399_v51  ;;  %v526_v54 = vpop.f32.mrb[7].mxu0 }
 0x302   :  { %409 = vsyncpa [#allocation3], 1 }
 0x303   :  { %410 = vsyncpa [#allocation5], 1 }

</bundles_post_ra>
